<compile_context>
chip_gen: v5e
topology: v5e:2x2
jax: 0.10.0
libtpu: 0.0.40
codegen_flags: <defaults>
</compile_context>

<pallas_src>
import functools
import math

import jax
import jax.numpy as jnp
from jax.experimental import pallas as pl
from jax.experimental.pallas import tpu as pltpu


def fourier_features_kernel(bt_ref, xt_ref, o_ref):
    # bt_ref: (nf, K) = (2*pi*B)^T  (resident, tiny)
    # xt_ref: (K, tn) column tile of x^T (N on the lane axis)
    # o_ref : (2*nf, tn) -> rows [0, nf) = cos, rows [nf, 2*nf) = sin
    nf = bt_ref.shape[0]
    # MXU matmul with f32 accumulation; the 2*pi scale is already folded into B.
    ang = jnp.dot(bt_ref[...], xt_ref[...], preferred_element_type=jnp.float32)
    o_ref[0:nf, :] = jnp.cos(ang).astype(o_ref.dtype)
    o_ref[nf:2 * nf, :] = jnp.sin(ang).astype(o_ref.dtype)


def pack_fourier_params(B):
    """Init-time transform of the frozen parameter B (done once, not per call):
    fold in the 2*pi factor and pre-transpose to (number_features, in_features)."""
    return (2.0 * math.pi) * B.T


def _pick_lane_tile(N, max_tile):
    """Pick the lane (N-axis) tile: multiple of 128, or a single full-N block."""
    assert max_tile % 128 == 0
    if N % 128 != 0:
        # A block spanning all of N is always legal; otherwise use a 128-multiple
        # tile and let Pallas mask the partial tail block.
        return N if N <= max_tile else max_tile
    tile = min(max_tile, N)
    if tile == N and N >= 256:
        # Keep at least 2 grid steps so both v7x TensorCores get work.
        tile = max(128, (N // 2 // 128) * 128)
    return tile


@functools.partial(jax.jit, static_argnames=("max_lane_tile",))
def fourier_features(x, bt_scaled, *, max_lane_tile=2048):
    """x: (N, in_features); bt_scaled: (number_features, in_features) = (2*pi*B).T.

    Returns (N, 2*number_features) = [cos(2*pi*x@B) | sin(2*pi*x@B)].
    """
    N, in_features = x.shape
    nf, in_features_b = bt_scaled.shape
    assert in_features == in_features_b
    out_features = 2 * nf

    tn = _pick_lane_tile(N, max_lane_tile)
    grid = (pl.cdiv(N, tn),)

    # Layout plumbing only: put the large N axis on the 128-lane dimension so
    # both the x tile and the output tile are lane-dense.
    xt = x.T  # (in_features, N)

    out_t = pl.pallas_call(
        fourier_features_kernel,
        out_shape=jax.ShapeDtypeStruct((out_features, N), x.dtype),
        grid_spec=pltpu.PrefetchScalarGridSpec(
            num_scalar_prefetch=0,
            grid=grid,
            in_specs=[
                # (2*pi*B)^T is tiny and reused by every tile: full-array block.
                pl.BlockSpec((nf, in_features), lambda i: (0, 0)),
                # Column tile of x^T: whole contraction axis, tn lanes.
                pl.BlockSpec((in_features, tn), lambda i: (0, i)),
            ],
            out_specs=pl.BlockSpec((out_features, tn), lambda i: (0, i)),
        ),
        compiler_params=pltpu.CompilerParams(
            dimension_semantics=("parallel",),
        ),
    )(bt_scaled, xt)

    # Transpose back to row-major (N, 2*nf); columns are [cos | sin].
    return out_t.T


def fourier_features_ref(x, B):
    proj = x @ B
    ang = 2.0 * jnp.pi * proj
    return jnp.concatenate([jnp.cos(ang), jnp.sin(ang)], axis=-1)


if __name__ == "__main__":
    # Module config (gnn_2d: 2-D coordinates in, 32 Fourier frequencies).
    in_features = 2
    number_features = 32
    sigma = 1.0

    key = jax.random.PRNGKey(0)
    kx, kb, kx2 = jax.random.split(key, 3)

    # Frozen parameter, as in the PyTorch module's __init__.
    B = jax.random.normal(kb, (in_features, number_features), dtype=jnp.float32) * sigma
    bt_scaled = pack_fourier_params(B)  # init-time: fold 2*pi, transpose

    # 16x16 grid of 2-D points -> N = 256 rows.
    N = 16 * 16
    x = jax.random.normal(kx, (N, in_features), dtype=jnp.float32)

    out = jax.block_until_ready(fourier_features(x, bt_scaled))
    ref = fourier_features_ref(x, B)
    assert out.shape == (N, 2 * number_features)
    assert jnp.allclose(out, ref, atol=1e-4, rtol=1e-4), "mismatch vs reference"

    # Non-divisible N exercises the pl.cdiv grid + masked tail block.
    N2 = 200
    x2 = jax.random.normal(kx2, (N2, in_features), dtype=jnp.float32)
    out2 = jax.block_until_ready(fourier_features(x2, bt_scaled, max_lane_tile=128))
    ref2 = fourier_features_ref(x2, B)
    assert out2.shape == (N2, 2 * number_features)
    assert jnp.allclose(out2, ref2, atol=1e-4, rtol=1e-4), "mismatch vs reference (tail)"

    print("KERNEL_OK")
</pallas_src>

<mosaic_0001>
module attributes {stable_mosaic.version = 11 : i64} {
  func.func @fourier_features_kernel(%arg0: i32, %arg1: memref<32x2xf32, #tpu.memory_space<vmem>>, %arg2: memref<2x128xf32, #tpu.memory_space<vmem>>, %arg3: memref<64x128xf32, #tpu.memory_space<vmem>>) attributes {dimension_semantics = [#tpu.dimension_semantics<parallel>], iteration_bounds = array<i64: 2>, scalar_prefetch = 0 : i64, scratch_operands = 0 : i64, tpu.core_type = #tpu.core_type<tc>, window_params = [{pipeline_mode = #tpu.pipeline_mode<synchronous>, transform_indices = @transform_0, window_bounds = array<i64: 32, 2>}, {transform_indices = @transform_1, window_bounds = array<i64: 2, 128>}, {transform_indices = @transform_2, window_bounds = array<i64: 64, 128>}]} {
    %c0 = arith.constant 0 : index
    %c0_0 = arith.constant 0 : index
    %0 = vector.load %arg1[%c0, %c0_0] : memref<32x2xf32, #tpu.memory_space<vmem>>, vector<32x2xf32>
    %c0_1 = arith.constant 0 : index
    %c0_2 = arith.constant 0 : index
    %1 = vector.load %arg2[%c0_1, %c0_2] : memref<2x128xf32, #tpu.memory_space<vmem>>, vector<2x128xf32>
    %cst = arith.constant dense<0.000000e+00> : vector<32x128xf32>
    %2 = tpu.matmul %0, %1, %cst {dimension_numbers = #tpu.dot_dimension_numbers<[1], [0], [0], [1], [0, 0, 1, 1], [], []>} : vector<32x2xf32>, vector<2x128xf32>, vector<32x128xf32> -> vector<32x128xf32>
    %3 = math.cos %2 : vector<32x128xf32>
    %c0_3 = arith.constant 0 : index
    %c0_4 = arith.constant 0 : index
    %4 = vector.load %arg3[%c0_3, %c0_4] : memref<64x128xf32, #tpu.memory_space<vmem>>, vector<32x128xf32>
    tpu.vector_store %arg3[%c0_3, %c0_4], %3 {strides = array<i32>} : memref<64x128xf32, #tpu.memory_space<vmem>>, vector<32x128xf32>,
    %5 = math.sin %2 : vector<32x128xf32>
    %c32 = arith.constant 32 : index
    %c0_5 = arith.constant 0 : index
    %6 = vector.load %arg3[%c32, %c0_5] : memref<64x128xf32, #tpu.memory_space<vmem>>, vector<32x128xf32>
    tpu.vector_store %arg3[%c32, %c0_5], %5 {strides = array<i32>} : memref<64x128xf32, #tpu.memory_space<vmem>>, vector<32x128xf32>,
    return
  }
  func.func @transform_0(%arg0: i32) -> (i32, i32) {
    %c0_i32 = arith.constant 0 : i32
    %c0_i32_0 = arith.constant 0 : i32
    %c0_i32_1 = arith.constant 0 : i32
    return %c0_i32, %c0_i32_0 : i32, i32
  }
  func.func @transform_1(%arg0: i32) -> (i32, i32) {
    %c0_i32 = arith.constant 0 : i32
    %c0_i32_0 = arith.constant 0 : i32
    return %c0_i32, %arg0 : i32, i32
  }
  func.func @transform_2(%arg0: i32) -> (i32, i32) {
    %c0_i32 = arith.constant 0 : i32
    %c0_i32_0 = arith.constant 0 : i32
    return %c0_i32, %arg0 : i32, i32
  }
}

</mosaic_0001>

<bundles_post_ra>
// kernel: fourier_features.1
= control target key start
LH: loop header
LB: loop body
LE: loop exit
PB: predicated region body
PF: predicated region fallthrough
CT: control target
= control target key end

     0   :  { %7 = vsyncpa [#allocation3], 0  ;;  %s2244_s0 = inlined_call_operand.vmem [shape: f32[32,2], index: 0, kind: input, shape index: {}]   ;;  %s2245_s1 = inlined_call_operand.vmem [shape: f32[2,256], index: 1, kind: input, shape index: {}]   ;;  %s2246_s2 = inlined_call_operand.hbm [shape: f32[64,256], index: 2, kind: output, shape index: {}]  }
   0x1   :  { %9 = vsyncpa [#allocation3 + $0x1], 0  ;;  %s1691_s9 = smov 0   ;;  %s1693_s10 = smov 0  }
   0x2   :  { %s1695_s11 = smov 0   ;;  %s1697_s12 = smov 0  }
   0x3 LB: > { %s1712_s13 = sadd.s32 4294967295, %s1664_s12   ;;  %s1511_s14 = sadd.s32 4294967294, %s1664_s12   ;;  %s1664_s12 = sphi %s1697_s12, %s2258_s12   ;;  %s1660_s11 = sphi %s1695_s11, %s2257_s11   ;;  %s1656_s10 = sphi %s1693_s10, %s2256_s10   ;;  %s1652_s9 = sphi %s1691_s9, %s2255_s9  }
   0x4   : > { %s1716_s15 = sadd.s32 1, %s1664_s12   ;;  %s69_s16 = sadd.s32 1, %s1660_s11 }
   0x5   : > { %s66_s17 = ssub.s32 %s1664_s12, %s1716_s15  ;;  %p79_p0 = scmp.ne.s32.totalorder %s1660_s11, %s1656_s10 }
   0x6   : > { %p67_p1 = scmp.eq.s32.totalorder %s66_s17, 0  ;;  %p80_p2 = scmp.eq.s32.totalorder %s1712_s13, 1 }
   0x7   : > { %p85_p3 = scmp.ne.s32.totalorder %s1656_s10, %s1652_s9  ;;  %p86_p4 = scmp.eq.s32.totalorder %s1511_s14, 1 }
   0x8   : > { %s1727_s18 = scalar_select %p67_p1, %s1660_s11, %s69_s16  }
   0x9   : > { %p1729_p5 = por %p80_p2, %p79_p0  ;;  %p1733_p6 = por %p86_p4, %p85_p3 }
   0xa   : > { %p1514_p7 = scmp.ge.s32.totalorder %s1664_s12, 1  ;;  %p114_p8 = scmp.lt.s32.totalorder %s1664_s12, 3 }
   0xc   : > { %p115_p9 = pnand %p1514_p7, %p114_p8 }
   0xd   : > { %p135_p10 = scmp.lt.s32.totalorder (!%p115_p9), %s1712_s13, 1  ;;  %s132_s6 = sand.u32 (!%p115_p9), 1, %s1656_s10  }
   0xe   : > { %118 = sbr.rel (%p115_p9) target bundleno = 354 (0x162), region = 28  ;;  %s1515_s7 = sshll.u32 (!%p115_p9), %s132_s6, 6 }
   0xf   : > { %s2088_s8 = scalar_lea.vmem (!%p115_p9), [#allocation2], %s1515_s7  ;;  %s1547_s14 = sshll.u32 (!%p115_p9), %s1712_s13, 3 }
  0x10   : > { %s1622_s28 = scalar_lea.hbm (!%p115_p9), %s2246_s2, 128 }
  0x13   : > { %s136_s21 = scalar_select %p135_p10, %s1712_s13, 1  ;;  %vm157_vm0 = vcmask 1041408   ;;  %v139_v1 = vld [vmem:[%s2244_s0] sm:$0xff]  ;;  %vm144_vm1 = vcmask 15360   ;;  %v140_v2 = vld [vmem:[%s2244_s0 + $0x8] sm:$0xff]  ;;  %v141_v3 = vld [vmem:[%s2244_s0 + $0x10] sm:$0xff] }
  0x14   : > { %v142_v4 = vld [vmem:[%s2244_s0 + $0x18] sm:$0xff]  ;;  %v1666_v28 = vmov 683565275   ;;  %v1667_v30 = vmov 2475754826   ;;  %s1435_s13 = scalar_lea.sflag [#allocation3], %s132_s6 }
  0x15   : > { %s1516_s22 = sshll.u32 %s136_s21, 1  ;;  %v1668_v32 = vmov 2131351028   ;;  %v1669_v34 = vmov 2102212464   ;;  %s1445_s21 = scalar_lea.hbm %s2246_s2, %s1547_s14 }
  0x16   : > { %s138_s25 = scalar_lea.vmem %s2245_s1, %s1516_s22  ;;  %v1670_v36 = vmov 920167782   ;;  %v1671_v46 = vmov 1326507024   ;;  %s1446_s22 = sshll.u32 %s2088_s8, 4  ;;  %s2209_s22 = int_to_ptr.vmem [resolvable:$true] %s1446_s22 }
  0x17   : > { %v143_v0 = vld [vmem:[%s138_s25] sm:$0x3]  ;;  %s1448_s23 = sshll.u32 %s1445_s21, 4  ;;  %s1449_s23 = int_to_ptr.hbm [resolvable:$true] %s1448_s23 }
  0x18   : > { %1517 = vmatpush.msk.msra.mxu0 %vm157_vm0, %v143_v0  ;;  %1550 = vmatpush.msk.msra.mxu1 %vm157_vm0, %v143_v0  ;;  %s1616_s24 = sshra.s32 %s1449_s23, 4  ;;  %s1617_s24 = int_to_ptr.hbm [resolvable:$true] %s1616_s24 }
  0x19   : > { %1551 = vmatpush.msk.msra.mxu2 %vm157_vm0, %v143_v0  ;;  %1552 = vmatpush.msk.msra.mxu3 %vm157_vm0, %v143_v0  ;;  %s1618_s25 = scalar_lea.hbm %s1617_s24, 64  ;;  %p1623_p0 = scmp.lt.s32.totalorder %s1617_s24, %s2246_s2 }
  0x1a   : > { %1518 = vmatmul.msk.f32.vlgmr.msra.gmra.mxu0 %vm144_vm1, %v139_v1  ;;  %1519 = vmatmul.msk.f32.vlgmr.msra.gmra.mxu1 %vm144_vm1, %v140_v2  ;;  %p1619_p11 = scmp.ne.s32.totalorder %s1617_s24, %s1618_s25  ;;  %p1624_p1 = scmp.lt.s32.totalorder %s1622_s28, %s1618_s25 }
  0x1b   : > { %1520 = vmatmul.msk.f32.vlgmr.msra.gmra.mxu2 %vm144_vm1, %v141_v3  ;;  %1521 = vmatmul.msk.f32.vlgmr.msra.gmra.mxu3 %vm144_vm1, %v142_v4 }
  0x1c   : > { %p1620_p12 = pnand %p1619_p11, %p1729_p5  ;;  %p1625_p2 = por %p1624_p1, %p1623_p0 }
  0x1e   : > { %p1621_p13 = pneg %p1620_p12 }
  0x20   : > { %p1626_p3 = pnand %p1625_p2, %p1621_p13 }
  0x97   : > { %v1756_v5 = vpop.f32.mrf.mxu0  ;;  %v1758_v6 = vpop.f32.mrf.mxu1 }
  0x98   : > { %v190_v7 = vand.u32 2147483647, %v1756_v5  ;;  %v193_v8 = vand.u32 2139095040, %v1756_v5  ;;  %v344_v9 = vand.u32 2147483647, %v1758_v6  ;;  %v347_v10 = vand.u32 2139095040, %v1758_v6 }
  0x9a   : > { %v194_v11 = vshrl.u32 %v193_v8, 23  ;;  %v197_v12 = vand.u32 8388607, %v190_v7  ;;  %v348_v13 = vshrl.u32 %v347_v10, 23  ;;  %v351_v17 = vand.u32 8388607, %v344_v9 }
  0x9c   : > { %v1522_v14 = vadd.s32 4294967169, %v194_v11  ;;  %v198_v15 = vor.u32 8388608, %v197_v12  ;;  %v1525_v16 = vadd.s32 4294967169, %v348_v13  ;;  %v352_v22 = vor.u32 8388608, %v351_v17 }
  0x9e   : > { %v200_v18 = vadd.s32 1, %v1522_v14  ;;  %v354_v19 = vadd.s32 1, %v1525_v16  ;;  %v1768_v21 = vshll.u32 %v198_v15, 8  ;;  %v1780_v39 = vshll.u32 %v352_v22, 8  ;;  %v1786_v44 = vpop.f32.mrf.mxu2 }
  0x9f   : > { %v501_v54 = vand.u32 2139095040, %v1786_v44 }
  0xa0   : > { %vm201_vm2 = vcmp.gt.s32.totalorder %v200_v18, 0  ;;  %vm355_vm3 = vcmp.gt.s32.totalorder %v354_v19, 0  ;;  %v239_v38 = vand.u32 65535, %v1768_v21  ;;  %v240_v43 = vshrl.u32 %v1768_v21, 16 }
  0xa1   : > { %v202_v20 = vsel %vm201_vm2, %v200_v18, 0  ;;  %v356_v24 = vsel %vm355_vm3, %v354_v19, 0  ;;  %v1826_v8 = vand.u32 65535, %v1780_v39 }
  0xa2   : > { %v204_v23 = vand.u32 31, %v202_v20  ;;  %v1770_v25 = vshrl.u32 %v202_v20, 5  ;;  %v1772_v26 = vand.u32 31, %v356_v24  ;;  %v1832_v16 = vshrl.u32 %v356_v24, 5 }
  0xa4   : > { %v205_v27 = vsub.s32 32, %v204_v23  ;;  %v207_v29 = vshll.u32 %v1666_v28, %v204_v23  ;;  %v210_v31 = vshll.u32 %v1667_v30, %v204_v23  ;;  %v213_v33 = vshll.u32 %v1668_v32, %v204_v23 }
  0xa5   : > { %v216_v35 = vshll.u32 %v1669_v34, %v204_v23  ;;  %v219_v37 = vshll.u32 %v1670_v36, %v204_v23  ;;  %vm222_vm4 = vcmp.lt.s32.totalorder %v1770_v25, 1  ;;  %vm225_vm5 = vcmp.lt.s32.totalorder %v1770_v25, 4 }
  0xa6   : > { %v208_v40 = vshrl.u32 %v1667_v30, %v205_v27  ;;  %v211_v41 = vshrl.u32 %v1668_v32, %v205_v27  ;;  %v214_v42 = vshrl.u32 %v1669_v34, %v205_v27  ;;  %v217_v45 = vshrl.u32 %v1670_v36, %v205_v27 }
  0xa7   : > { %v220_v47 = vshrl.u32 %v1671_v46, %v205_v27  ;;  %v1793_v51 = vsub.s32 32, %v1772_v26  ;;  %vm224_vm6 = vcmp.lt.s32.totalorder %v1770_v25, 3  ;;  %v206_v55 = vshrl.u32 %v1666_v28, %v205_v27 }
  0xa8   : > { %v209_v48 = vor.u32 %v208_v40, %v207_v29  ;;  %v212_v49 = vor.u32 %v211_v41, %v210_v31  ;;  %v215_v50 = vor.u32 %v214_v42, %v213_v33  ;;  %v218_v52 = vor.u32 %v217_v45, %v216_v35 }
  0xa9   : > { %v221_v53 = vor.u32 %v220_v47, %v219_v37  ;;  %vm223_vm7 = vcmp.lt.s32.totalorder %v1770_v25, 2  ;;  %v361_v60 = vshll.u32 %v1666_v28, %v1772_v26  ;;  %v364_v61 = vshll.u32 %v1667_v30, %v1772_v26 }
  0xaa   : > { %v230_v56 = vsel %vm222_vm4, %v209_v48, %v212_v49  ;;  %v234_v57 = vsel %vm222_vm4, %v212_v49, %v215_v50  ;;  %v231_v58 = vsel %vm225_vm5, %v218_v52, 920167782  ;;  %v227_v62 = vsel %vm225_vm5, %v215_v50, 2102212464 }
  0xab   : > { %v235_v59 = vsel %vm225_vm5, %v221_v53, 1326507024  ;;  %v232_v63 = vsel %vm224_vm6, %v215_v50, %v231_v58  ;;  %v362_v1 = vshrl.u32 %v1667_v30, %v1793_v51  ;;  %v365_v4 = vshrl.u32 %v1668_v32, %v1793_v51 }
  0xac   : > { %v236_v0 = vsel %vm224_vm6, %v218_v52, %v235_v59  ;;  %v233_v2 = vsel %vm223_vm7, %v230_v56, %v232_v63  ;;  %v226_v14 = vsel %vm222_vm4, %v206_v55, %v209_v48  ;;  %v228_v15 = vsel %vm224_vm6, %v212_v49, %v227_v62 }
  0xad   : > { %v237_v3 = vsel %vm223_vm7, %v234_v57, %v236_v0  ;;  %v263_v12 = vand.u32 65535, %v233_v2  ;;  %v264_v13 = vshrl.u32 %v233_v2, 16  ;;  %v1834_v17 = vor.u32 %v362_v1, %v361_v60 }
  0xae   : > { %v241_v10 = vand.u32 65535, %v237_v3  ;;  %v242_v11 = vshrl.u32 %v237_v3, 16  ;;  %v1836_v20 = vor.u32 %v365_v4, %v364_v61  ;;  %v367_v22 = vshll.u32 %v1668_v32, %v1772_v26 }
  0xaf   : > { %v266_v27 = vmul.u32 %v264_v13, %v239_v38  ;;  %v267_v29 = vmul.u32 %v263_v12, %v240_v43  ;;  %v368_v31 = vshrl.u32 %v1669_v34, %v1793_v51  ;;  %v265_v37 = vmul.u32 %v263_v12, %v239_v38 }
  0xb0   : > { %v244_v18 = vmul.u32 %v242_v11, %v239_v38  ;;  %v245_v19 = vmul.u32 %v241_v10, %v240_v43  ;;  %v243_v23 = vmul.u32 %v241_v10, %v239_v38  ;;  %v246_v33 = vmul.u32 %v242_v11, %v240_v43 }
  0xb1   : > { %v268_v24 = vmul.u32 %v264_v13, %v240_v43  ;;  %v269_v45 = vshll.u32 %v266_v27, 16  ;;  %v271_v48 = vshll.u32 %v267_v29, 16  ;;  %v370_v49 = vshll.u32 %v1669_v34, %v1772_v26 }
  0xb2   : > { %v247_v35 = vshll.u32 %v244_v18, 16  ;;  %v248_v40 = vshrl.u32 %v244_v18, 16  ;;  %v249_v41 = vshll.u32 %v245_v19, 16  ;;  %v250_v42 = vshrl.u32 %v245_v19, 16 }
  0xb3   : > { %v1672_v50 = vmov 0   ;;  %vm273_vm9 = vc.u32 %v265_v37, %v269_v45  ;;  %v275_v53 = vadd.s32 %v269_v45, %v265_v37  ;;  %v371_v55 = vshrl.u32 %v1670_v36, %v1793_v51 }
  0xb4   : > { %vm251_vm8 = vc.u32 %v243_v23, %v247_v35  ;;  %v253_v47 = vadd.s32 %v247_v35, %v243_v23  ;;  %v274_v43 = vsel %vm273_vm9, 1, %v1672_v50  ;;  %v373_v56 = vshll.u32 %v1670_v36, %v1772_v26 }
  0xb5   : > { %v252_v52 = vsel %vm251_vm8, 1, %v1672_v50  ;;  %v276_v58 = vadd.s32 %v274_v43, %v268_v24  ;;  %vm277_vm11 = vc.u32 %v275_v53, %v271_v48  ;;  %v1851_v59 = vor.u32 %v368_v31, %v367_v22 }
  0xb6   : > { %v254_v38 = vadd.s32 %v252_v52, %v246_v33  ;;  %vm255_vm10 = vc.u32 %v253_v47, %v249_v41  ;;  %v278_v61 = vsel %vm277_vm11, 1, %v1672_v50  ;;  %v372_v62 = vor.u32 %v371_v55, %v370_v49 }
  0xb7   : > { %v256_v57 = vsel %vm255_vm10, 1, %v1672_v50  ;;  %v374_v63 = vshrl.u32 %v1671_v46, %v1793_v51  ;;  %v270_v0 = vshrl.u32 %v266_v27, 16  ;;  %v280_v1 = vadd.s32 %v278_v61, %v276_v58 }
  0xb8   : > { %v258_v60 = vadd.s32 %v256_v57, %v254_v38  ;;  %vm376_vm12 = vcmp.lt.s32.totalorder %v1832_v16, 1  ;;  %vm378_vm13 = vcmp.lt.s32.totalorder %v1832_v16, 3  ;;  %v272_v2 = vshrl.u32 %v267_v29, 16 }
  0xb9   : > { %v375_v3 = vor.u32 %v374_v63, %v373_v56  ;;  %vm379_vm14 = vcmp.lt.s32.totalorder %v1832_v16, 4  ;;  %v1859_v4 = vadd.s32 %v275_v53, %v271_v48  ;;  %v281_v10 = vadd.s32 %v280_v1, %v270_v0 }
  0xba   : > { %v259_v26 = vadd.s32 %v258_v60, %v248_v40  ;;  %v384_v11 = vsel %vm376_vm12, %v1834_v17, %v1836_v20  ;;  %v385_v12 = vsel %vm379_vm14, %v372_v62, 920167782  ;;  %vm377_vm15 = vcmp.lt.s32.totalorder %v1832_v16, 2 }
  0xbb   : > { %v386_v18 = vsel %vm378_vm13, %v1851_v59, %v385_v12  ;;  %v388_v19 = vsel %vm376_vm12, %v1836_v20, %v1851_v59  ;;  %v229_v22 = vsel %vm223_vm7, %v226_v14, %v228_v15  ;;  %v282_v23 = vadd.s32 %v281_v10, %v272_v2 }
  0xbc   : > { %v1867_v13 = vadd.s32 %v259_v26, %v250_v42  ;;  %v387_v27 = vsel %vm377_vm15, %v384_v11, %v386_v18  ;;  %v389_v29 = vsel %vm379_vm14, %v375_v3, 1326507024  ;;  %v394_v33 = vshrl.u32 %v1780_v39, 16 }
  0xbd   : > { %v390_v31 = vsel %vm378_vm13, %v372_v62, %v389_v29  ;;  %v417_v35 = vand.u32 65535, %v387_v27  ;;  %v286_v37 = vadd.s32 1, %v282_v23  ;;  %v418_v14 = vshrl.u32 %v387_v27, 16 }
  0xbe   : > { %vm285_vm0 = vc.u32 %v1867_v13, %v1859_v4  ;;  %v391_v25 = vsel %vm377_vm15, %v388_v19, %v390_v31  ;;  %v502_v15 = vshrl.u32 %v501_v54, 23  ;;  %v283_v24 = vmul.u32 %v1768_v21, %v229_v22 }
  0xbf   : > { %v395_v40 = vand.u32 65535, %v391_v25  ;;  %v396_v41 = vshrl.u32 %v391_v25, 16  ;;  %v287_v42 = vsel %vm285_vm0, %v286_v37, %v282_v23  ;;  %v420_v45 = vmul.u32 %v418_v14, %v1826_v8 }
  0xc0   : > { %v421_v47 = vmul.u32 %v417_v35, %v394_v33  ;;  %v288_v48 = vadd.s32 %v287_v42, %v283_v24  ;;  %v360_v49 = vshrl.u32 %v1666_v28, %v1793_v51  ;;  %v419_v55 = vmul.u32 %v417_v35, %v1826_v8 }
  0xc1   : > { %v398_v52 = vmul.u32 %v396_v41, %v1826_v8  ;;  %v399_v53 = vmul.u32 %v395_v40, %v394_v33  ;;  %v422_v38 = vmul.u32 %v418_v14, %v394_v33  ;;  %v423_v43 = vshll.u32 %v420_v45, 16 }
  0xc2   : > { %v1528_v54 = vadd.s32 4294967169, %v502_v15  ;;  %v289_v56 = vadd.s32 536870912, %v288_v48  ;;  %v397_v21 = vmul.u32 %v395_v40, %v1826_v8  ;;  %v400_v57 = vmul.u32 %v396_v41, %v394_v33 }
  0xc3   : > { %v401_v58 = vshll.u32 %v398_v52, 16  ;;  %v403_v60 = vshll.u32 %v399_v53, 16  ;;  %v425_v61 = vshll.u32 %v421_v47, 16  ;;  %vm427_vm1 = vc.u32 %v419_v55, %v423_v43 }
  0xc4   : > { %v429_v62 = vadd.s32 %v423_v43, %v419_v55  ;;  %v290_v63 = vshrl.u32 %v289_v56, 30  ;;  %v428_v0 = vsel %vm427_vm1, 1, %v1672_v50  ;;  %v381_v8 = vsel %vm379_vm14, %v1851_v59, 2102212464 }
  0xc5   : > { %vm405_vm2 = vc.u32 %v397_v21, %v401_v58  ;;  %v407_v51 = vadd.s32 %v401_v58, %v397_v21  ;;  %v430_v26 = vadd.s32 %v428_v0, %v422_v38  ;;  %v498_v12 = vand.u32 2147483647, %v1786_v44 }
  0xc6   : > { %v406_v1 = vsel %vm405_vm2, 1, %v1672_v50  ;;  %vm431_vm3 = vc.u32 %v429_v62, %v425_v61  ;;  %v291_v2 = vshll.u32 %v290_v63, 30  ;;  %v508_v18 = vadd.s32 1, %v1528_v54 }
  0xc7   : > { %v408_v3 = vadd.s32 %v406_v1, %v400_v57  ;;  %vm409_vm4 = vc.u32 %v407_v51, %v403_v60  ;;  %v432_v11 = vsel %vm431_vm3, 1, %v1672_v50  ;;  %v380_v22 = vsel %vm376_vm12, %v360_v49, %v1834_v17 }
  0xc8   : > { %v410_v10 = vsel %vm409_vm4, 1, %v1672_v50  ;;  %v292_v19 = vsub.s32 %v288_v48, %v291_v2  ;;  %v434_v27 = vadd.s32 %v432_v11, %v430_v26  ;;  %v382_v59 = vsel %vm378_vm13, %v1836_v20, %v381_v8 }
  0xc9   : > { %v412_v23 = vadd.s32 %v410_v10, %v408_v3  ;;  %v402_v29 = vshrl.u32 %v398_v52, 16  ;;  %v424_v31 = vshrl.u32 %v420_v45, 16  ;;  %vm509_vm5 = vcmp.gt.s32.totalorder %v508_v18, 0 }
  0xca   : > { %vm293_vm6 = vcmp.lt.s32.totalorder %v292_v19, 0  ;;  %v294_v33 = vsub.s32 0, %v292_v19  ;;  %v404_v35 = vshrl.u32 %v399_v53, 16  ;;  %v426_v37 = vshrl.u32 %v421_v47, 16 }
  0xcb   : > { %v314_v25 = vsub.s32 4, %v290_v63  ;;  %v413_v14 = vadd.s32 %v412_v23, %v402_v29  ;;  %v435_v15 = vadd.s32 %v434_v27, %v424_v31  ;;  %v510_v24 = vsel %vm509_vm5, %v508_v18, 0 }
  0xcc   : > { %v295_v40 = vsel %vm293_vm6, %v294_v33, %v292_v19  ;;  %vm192_vm7 = vcmp.lt.s32.totalorder %v1756_v5, 0  ;;  %v383_v20 = vsel %vm377_vm15, %v380_v22, %v382_v59  ;;  %v1918_v45 = vadd.s32 %v429_v62, %v425_v61 }
  0xcd   : > { %v296_v17 = vclz %v295_v40  ;;  %v1914_v41 = vadd.s32 %v413_v14, %v404_v35  ;;  %v436_v42 = vadd.s32 %v435_v15, %v426_v37  ;;  %v505_v48 = vand.u32 8388607, %v498_v12 }
  0xce   : > { %v512_v47 = vand.u32 31, %v510_v24  ;;  %v315_v52 = vsel %vm192_vm7, %v314_v25, %v290_v63  ;;  %vm1930_vm9 = vcmp.le.f32.partialorder %v190_v7, 0.7853982  ;;  %v284_v38 = vadd.s32 %v1859_v4, %v1867_v13 }
  0xcf   : > { %v1523_v49 = vadd.s32 4294967294, %v296_v17  ;;  %vm439_vm8 = vc.u32 %v1914_v41, %v1918_v45  ;;  %v440_v53 = vadd.s32 1, %v436_v42  ;;  %v437_v43 = vmul.u32 %v1780_v39, %v383_v20 }
  0xd0   : > { %v1926_v55 = vsub.s32 32, %v512_v47  ;;  %v317_v56 = vsel %vm1930_vm9, 0, %v315_v52  ;;  %v506_v57 = vor.u32 8388608, %v505_v48  ;;  %v1939_v62 = vshrl.u32 %v510_v24, 5 }
  0xd1   : > { %vm1524_vm10 = vcmp.lt.s32.totalorder %v1523_v49, 0  ;;  %v441_v21 = vsel %vm439_vm8, %v440_v53, %v436_v42  ;;  %v515_v63 = vshll.u32 %v1666_v28, %v512_v47  ;;  %v524_v2 = vshll.u32 %v1669_v34, %v512_v47 }
  0xd2   : > { %v299_v54 = vsel %vm1524_vm10, 0, %v1523_v49  ;;  %v442_v61 = vadd.s32 %v441_v21, %v437_v43  ;;  %v516_v4 = vshrl.u32 %v1667_v30, %v1926_v55  ;;  %v519_v39 = vshrl.u32 %v1668_v32, %v1926_v55 }
  0xd3   : > { %v300_v58 = vsub.s32 32, %v299_v54  ;;  %v304_v60 = vsub.s32 4294967266, %v299_v54  ;;  %v301_v7 = vshll.u32 %v292_v19, %v299_v54  ;;  %v525_v1 = vshrl.u32 %v1670_v36, %v1926_v55 }
  0xd4   : > { %v443_v0 = vadd.s32 536870912, %v442_v61  ;;  %v522_v26 = vshrl.u32 %v1669_v34, %v1926_v55  ;;  %v527_v8 = vshll.u32 %v1670_v36, %v512_v47  ;;  %v528_v3 = vshrl.u32 %v1671_v46, %v1926_v55 }
  0xd5   : > { %v302_v13 = vshrl.u32 %v284_v38, %v300_v58  ;;  %v305_v51 = vadd.s32 127, %v304_v60  ;;  %v518_v19 = vshll.u32 %v1667_v30, %v512_v47  ;;  %v521_v22 = vshll.u32 %v1668_v32, %v512_v47 }
  0xd6   : > { %v1954_v18 = vshrl.u32 %v443_v0, 30  ;;  %v526_v23 = vor.u32 %v525_v1, %v524_v2  ;;  %v529_v27 = vor.u32 %v528_v3, %v527_v8  ;;  %v517_v31 = vor.u32 %v516_v4, %v515_v63 }
  0xd7   : > { %v303_v10 = vor.u32 %v302_v13, %v301_v7  ;;  %v306_v11 = vshll.u32 %v305_v51, 23  ;;  %v1959_v33 = vor.u32 %v519_v39, %v518_v19  ;;  %v954_v35 = vadd.s32 3, %v317_v56 }
  0xd8   : > { %v445_v29 = vshll.u32 %v1954_v18, 30  ;;  %v523_v37 = vor.u32 %v522_v26, %v521_v22  ;;  %v1961_v25 = vshll.u32 %v506_v57, 8  ;;  %vm533_vm11 = vcmp.lt.s32.totalorder %v1939_v62, 4 }
  0xd9   : > { %v307_v59 = vor.u32 4788187, %v306_v11  ;;  %v310_v15 = vcvt.s32.f32 %v303_v10  ;;  %vm530_vm12 = vcmp.lt.s32.totalorder %v1939_v62, 1  ;;  %vm532_vm13 = vcmp.lt.s32.totalorder %v1939_v62, 3 }
  0xda   : > { %v446_v24 = vsub.s32 %v442_v61, %v445_v29  ;;  %v539_v40 = vsel %vm533_vm11, %v526_v23, 920167782  ;;  %v543_v17 = vsel %vm533_vm11, %v529_v27, 1326507024  ;;  %v538_v48 = vsel %vm530_vm12, %v517_v31, %v1959_v33 }
  0xdb   : > { %v308_v14 = vand.u32 2147483647, %v307_v59  ;;  %v540_v47 = vsel %vm532_vm13, %v523_v37, %v539_v40  ;;  %v542_v49 = vsel %vm530_vm12, %v1959_v33, %v523_v37  ;;  %v544_v52 = vsel %vm532_vm13, %v526_v23, %v543_v17 }
  0xdc   : > { %vm447_vm14 = vcmp.lt.s32.totalorder %v446_v24, 0  ;;  %v448_v20 = vsub.s32 0, %v446_v24  ;;  %v1980_v38 = vand.u32 3, %v317_v56  ;;  %vm531_vm15 = vcmp.lt.s32.totalorder %v1939_v62, 2 }
  0xdd   : > { %v311_v42 = vmul.f32 %v310_v15, %v308_v14  ;;  %v1983_v54 = vand.u32 3, %v954_v35  ;;  %v1987_v57 = vsel %vm531_vm15, %v538_v48, %v540_v47  ;;  %v547_v58 = vand.u32 65535, %v1961_v25 }
  0xde   : > { %v449_v43 = vsel %vm447_vm14, %v448_v20, %v446_v24  ;;  %v545_v61 = vsel %vm531_vm15, %v542_v49, %v544_v52  ;;  %v548_v56 = vshrl.u32 %v1961_v25, 16  ;;  %v571_v7 = vand.u32 65535, %v1987_v57 }
  0xdf   : > { %v312_v53 = vxor.u32 2147483648, %v311_v42  ;;  %v450_v21 = vclz %v449_v43  ;;  %v514_v39 = vshrl.u32 %v1666_v28, %v1926_v55  ;;  %v572_v13 = vshrl.u32 %v1987_v57, 16 }
  0xe0   : > { %v438_v0 = vadd.s32 %v1918_v45, %v1914_v41  ;;  %v549_v1 = vand.u32 65535, %v545_v61  ;;  %v550_v26 = vshrl.u32 %v545_v61, 16  ;;  %v468_v2 = vsub.s32 4, %v1954_v18 }
  0xe1   : > { %v313_v60 = vsel %vm192_vm7, %v312_v53, %v311_v42  ;;  %v1526_v4 = vadd.s32 4294967294, %v450_v21  ;;  %v2011_v16 = vsel %vm530_vm12, %v514_v39, %v517_v31  ;;  %v2015_v55 = vsel %vm533_vm11, %v523_v37, 2102212464 }
  0xe2   : > { %v1999_v63 = vsel %vm1930_vm9, %v1756_v5, %v313_v60  ;;  %v573_v11 = vmul.u32 %v571_v7, %v547_v58  ;;  %v552_v41 = vmul.u32 %v550_v26, %v547_v58  ;;  %v2017_v45 = vmul.u32 %v572_v13, %v547_v58 }
  0xe3   : > { %v318_v51 = vmul.f32 %v1999_v63, %v1999_v63  ;;  %vm1527_vm0 = vcmp.lt.s32.totalorder %v1526_v4, 0  ;;  %v551_v59 = vmul.u32 %v549_v1, %v547_v58  ;;  %v2019_v29 = vmul.u32 %v549_v1, %v548_v56 }
  0xe4   : > { %v453_v10 = vsel %vm1527_vm0, 0, %v1526_v4  ;;  %vm346_vm1 = vcmp.lt.s32.totalorder %v1758_v6, 0  ;;  %v555_v14 = vshll.u32 %v552_v41, 16  ;;  %v554_v17 = vmul.u32 %v550_v26, %v548_v56 }
  0xe5   : > { %v319_v8 = vmul.f32 -0.001358992, %v318_v51  ;;  %v326_v3 = vmul.f32 -0.00019511016, %v318_v51  ;;  %v454_v19 = vsub.s32 32, %v453_v10  ;;  %v458_v22 = vsub.s32 4294967266, %v453_v10 }
  0xe6   : > { %v455_v31 = vshll.u32 %v446_v24, %v453_v10  ;;  %v557_v42 = vshll.u32 %v2019_v29, 16  ;;  %vm559_vm2 = vc.u32 %v551_v59, %v555_v14  ;;  %v561_v47 = vadd.s32 %v555_v14, %v551_v59 }
  0xe7   : > { %v320_v23 = vadd.f32 0.041655596, %v319_v8  ;;  %v327_v27 = vadd.f32 0.008332121, %v326_v3  ;;  %v456_v35 = vshrl.u32 %v438_v0, %v454_v19  ;;  %v459_v37 = vadd.s32 127, %v458_v22 }
  0xe8   : > { %vm339_vm3 = vcmp.eq.s32.totalorder %v1980_v38, 2  ;;  %v560_v53 = vsel %vm559_vm2, 1, %v1672_v50  ;;  %v2025_v43 = vmul.u32 %v571_v7, %v548_v56  ;;  %vm336_vm4 = vcmp.eq.s32.totalorder %v1980_v38, 0 }
  0xe9   : > { %v321_v15 = vmul.f32 %v320_v23, %v318_v51  ;;  %v328_v40 = vmul.f32 %v327_v27, %v318_v51  ;;  %v457_v20 = vor.u32 %v456_v35, %v455_v31  ;;  %v460_v48 = vshll.u32 %v459_v37, 23 }
  0xea   : > { %vm957_vm5 = vcmp.eq.s32.totalorder %v1983_v54, 0  ;;  %vm960_vm6 = vcmp.eq.s32.totalorder %v1983_v54, 2  ;;  %vm2032_vm7 = vcmp.le.f32.partialorder %v344_v9, 0.7853982  ;;  %v556_v57 = vshrl.u32 %v552_v41, 16 }
  0xeb   : > { %v322_v49 = vadd.f32 -0.4999988, %v321_v15  ;;  %v329_v52 = vadd.f32 -0.16666654, %v328_v40  ;;  %v461_v21 = vor.u32 4788187, %v460_v48  ;;  %v562_v58 = vadd.s32 %v560_v53, %v554_v17 }
  0xec   : > { %vm563_vm8 = vc.u32 %v561_v47, %v557_v42  ;;  %vm335_vm9 = vcmp.lt.s32.totalorder %v1980_v38, 2  ;;  %vm956_vm10 = vcmp.lt.s32.totalorder %v1983_v54, 2  ;;  %v577_v4 = vshll.u32 %v2017_v45, 16 }
  0xed   : > { %v323_v60 = vmul.f32 %v322_v49, %v318_v51  ;;  %v330_v61 = vmul.f32 %v329_v52, %v318_v51  ;;  %v564_v7 = vsel %vm563_vm8, 1, %v1672_v50  ;;  %vm333_vm11 = vweird.f32 %v1756_v5 }
  0xee   : > { %v462_v9 = vand.u32 2147483647, %v461_v21  ;;  %v464_v39 = vcvt.s32.f32 %v457_v20  ;;  %v566_v0 = vadd.s32 %v564_v7, %v562_v58  ;;  %v576_v1 = vmul.u32 %v572_v13, %v548_v56 }
  0xef   : > { %v324_v26 = vadd.f32 1.0, %v323_v60  ;;  %v331_v8 = vadd.f32 1.0, %v330_v61  ;;  %v579_v51 = vshll.u32 %v2025_v43, 16  ;;  %vm581_vm12 = vc.u32 %v573_v11, %v577_v4 }
  0xf0   : > { %v465_v3 = vmul.f32 %v464_v39, %v462_v9  ;;  %v567_v10 = vadd.s32 %v566_v0, %v556_v57  ;;  %v582_v19 = vsel %vm581_vm12, 1, %v1672_v50  ;;  %v583_v22 = vadd.s32 %v577_v4, %v573_v11 }
  0xf1   : > { %v332_v41 = vmul.f32 %v331_v8, %v1999_v63  ;;  %v340_v23 = vxor.u32 2147483648, %v324_v26  ;;  %v469_v56 = vsel %vm346_vm1, %v468_v2, %v1954_v18  ;;  %v584_v13 = vadd.s32 %v582_v19, %v576_v1 }
  0xf2   : > { %v466_v27 = vxor.u32 2147483648, %v465_v3  ;;  %v536_v59 = vsel %vm532_vm13, %v1959_v33, %v2015_v55  ;;  %v558_v11 = vshrl.u32 %v2019_v29, 16  ;;  %vm585_vm14 = vc.u32 %v583_v22, %v579_v51  ;;  %v2066_v33 = vpop.f32.mrf.mxu3 }
  0xf3   : > { %v337_v63 = vxor.u32 2147483648, %v332_v41  ;;  %v578_v31 = vshrl.u32 %v2017_v45, 16  ;;  %v580_v35 = vshrl.u32 %v2025_v43, 16  ;;  %v586_v37 = vsel %vm585_vm14, 1, %v1672_v50 }
  0xf4   : > { %v341_v18 = vsel %vm339_vm3, %v340_v23, %v332_v41  ;;  %v467_v2 = vsel %vm346_vm1, %v466_v27, %v465_v3  ;;  %v2064_v14 = vadd.s32 %v567_v10, %v558_v11  ;;  %v588_v15 = vadd.s32 %v586_v37, %v584_v13 }
  0xf5   : > { %v338_v55 = vsel %vm336_vm4, %v324_v26, %v337_v63  ;;  %v959_v45 = vsel %vm957_vm5, %v324_v26, %v337_v63  ;;  %v962_v29 = vsel %vm960_vm6, %v340_v23, %v332_v41  ;;  %v470_v40 = vsel %vm2032_vm7, %v1758_v6, %v467_v2 }
  0xf6   : > { %v342_v17 = vsel %vm335_vm9, %v338_v55, %v341_v18  ;;  %v963_v42 = vsel %vm956_vm10, %v959_v45, %v962_v29  ;;  %v472_v20 = vmul.f32 %v470_v40, %v470_v40  ;;  %v589_v48 = vadd.s32 %v588_v15, %v578_v31 }
  0xf7   : > { %v343_v47 = vsel %vm333_vm11, nan, %v342_v17  ;;  %v964_v49 = vsel %vm333_vm11, nan, %v963_v42  ;;  %v2085_v52 = vadd.s32 %v583_v22, %v579_v51  ;;  %v655_v53 = vand.u32 2139095040, %v2066_v33 }
  0xf8   : > { %806 = vst [vmem:[%s2088_s8] sm:$0xff] %v343_v47  ;;  %v473_v38 = vmul.f32 -0.001358992, %v472_v20  ;;  %v480_v54 = vmul.f32 -0.00019511016, %v472_v20  ;;  %v537_v43 = vsel %vm531_vm15, %v2011_v16, %v536_v59  ;;  %v590_v21 = vadd.s32 %v589_v48, %v580_v35 }
  0xf9   : > { %1430 = vst [vmem:[%s2088_s8 + $0x20] sm:$0xff] %v964_v49  ;;  %vm593_vm13 = vc.u32 %v2064_v14, %v2085_v52  ;;  %v656_v5 = vshrl.u32 %v655_v53, 23  ;;  %v471_v61 = vsel %vm2032_vm7, 0, %v469_v56  ;;  %v591_v7 = vmul.u32 %v1961_v25, %v537_v43 }
  0xfa   : > { %v474_v57 = vadd.f32 0.041655596, %v473_v38  ;;  %v481_v58 = vadd.f32 0.008332121, %v480_v54  ;;  %v594_v60 = vadd.s32 1, %v590_v21  ;;  %v1109_v8 = vadd.s32 3, %v471_v61 }
  0xfb   : > { %v1531_v4 = vadd.s32 4294967169, %v656_v5  ;;  %v488_v22 = vand.u32 3, %v471_v61  ;;  %v652_v13 = vand.u32 2147483647, %v2066_v33  ;;  %vm487_vm0 = vweird.f32 %v1758_v6 }
  0xfc   : > { %v475_v9 = vmul.f32 %v474_v57, %v472_v20  ;;  %v482_v39 = vmul.f32 %v481_v58, %v472_v20  ;;  %v595_v0 = vsel %vm593_vm13, %v594_v60, %v590_v21  ;;  %v1110_v56 = vand.u32 3, %v1109_v8 }
  0xfd   : > { %v596_v62 = vadd.s32 %v595_v0, %v591_v7  ;;  %v662_v16 = vadd.s32 1, %v1531_v4  ;;  %vm489_vm1 = vcmp.lt.s32.totalorder %v488_v22, 2  ;;  %vm490_vm2 = vcmp.eq.s32.totalorder %v488_v22, 0 }
  0xfe   : > { %v476_v1 = vadd.f32 -0.4999988, %v475_v9  ;;  %v483_v26 = vadd.f32 -0.16666654, %v482_v39  ;;  %vm493_vm3 = vcmp.eq.s32.totalorder %v488_v22, 2  ;;  %vm1111_vm4 = vcmp.lt.s32.totalorder %v1110_v56, 2 }
  0xff   : > { %v597_v51 = vadd.s32 536870912, %v596_v62  ;;  %vm663_vm15 = vcmp.gt.s32.totalorder %v662_v16, 0  ;;  %vm1112_vm5 = vcmp.eq.s32.totalorder %v1110_v56, 0  ;;  %v659_v37 = vand.u32 8388607, %v652_v13 }
 0x100   : > { %v477_v3 = vmul.f32 %v476_v1, %v472_v20  ;;  %v484_v10 = vmul.f32 %v483_v26, %v472_v20  ;;  %v664_v19 = vsel %vm663_vm15, %v662_v16, 0  ;;  %vm1115_vm6 = vcmp.eq.s32.totalorder %v1110_v56, 2 }
 0x101   : > { %v2100_v41 = vshrl.u32 %v597_v51, 30  ;;  %v666_v24 = vand.u32 31, %v664_v19  ;;  %v660_v53 = vor.u32 8388608, %v659_v37  ;;  %v2119_v38 = vshrl.u32 %v664_v19, 5 }
 0x102   : > { %v478_v23 = vadd.f32 1.0, %v477_v3  ;;  %v485_v25 = vadd.f32 1.0, %v484_v10  ;;  %v592_v39 = vadd.s32 %v2085_v52, %v2064_v14  ;;  %vm500_vm14 = vcmp.lt.s32.totalorder %v1786_v44, 0 }
 0x103   : > { %v599_v27 = vshll.u32 %v2100_v41, 30  ;;  %v2104_v59 = vsub.s32 32, %v666_v24  ;;  %v669_v54 = vshll.u32 %v1666_v28, %v666_v24  ;;  %v672_v43 = vshll.u32 %v1667_v30, %v666_v24 }
 0x104   : > { %v486_v11 = vmul.f32 %v485_v25, %v470_v40  ;;  %v494_v63 = vxor.u32 2147483648, %v478_v23  ;;  %v675_v57 = vshll.u32 %v1668_v32, %v666_v24  ;;  %v678_v58 = vshll.u32 %v1669_v34, %v666_v24 }
 0x105   : > { %v600_v31 = vsub.s32 %v596_v62, %v599_v27  ;;  %v670_v2 = vshrl.u32 %v1667_v30, %v2104_v59  ;;  %v673_v20 = vshrl.u32 %v1668_v32, %v2104_v59  ;;  %v676_v21 = vshrl.u32 %v1669_v34, %v2104_v59 }
 0x106   : > { %v491_v35 = vxor.u32 2147483648, %v486_v11  ;;  %v495_v55 = vsel %vm493_vm3, %v494_v63, %v486_v11  ;;  %v1117_v29 = vsel %vm1115_vm6, %v494_v63, %v486_v11  ;;  %v679_v6 = vshrl.u32 %v1670_v36, %v2104_v59 }
 0x107   : > { %vm601_vm7 = vcmp.lt.s32.totalorder %v600_v31, 0  ;;  %v602_v18 = vsub.s32 0, %v600_v31  ;;  %v671_v60 = vor.u32 %v670_v2, %v669_v54  ;;  %v2130_v61 = vor.u32 %v673_v20, %v672_v43 }
 0x108   : > { %v492_v15 = vsel %vm490_vm2, %v478_v23, %v491_v35  ;;  %v1114_v45 = vsel %vm1112_vm5, %v478_v23, %v491_v35  ;;  %v681_v7 = vshll.u32 %v1670_v36, %v666_v24  ;;  %v677_v4 = vor.u32 %v676_v21, %v675_v57 }
 0x109   : > { %v496_v40 = vsel %vm489_vm1, %v492_v15, %v495_v55  ;;  %v1118_v17 = vsel %vm1111_vm4, %v1114_v45, %v1117_v29  ;;  %v603_v42 = vsel %vm601_vm7, %v602_v18, %v600_v31  ;;  %v680_v30 = vor.u32 %v679_v6, %v678_v58 }
 0x10a   : > { %v497_v48 = vsel %vm487_vm0, nan, %v496_v40  ;;  %v1119_v47 = vsel %vm487_vm0, nan, %v1118_v17  ;;  %v604_v49 = vclz %v603_v42  ;;  %v682_v9 = vshrl.u32 %v1671_v46, %v2104_v59 }
 0x10b   : > { %807 = vst [vmem:[%s2088_s8 + $0x8] sm:$0xff] %v497_v48  ;;  %vm684_vm9 = vcmp.lt.s32.totalorder %v2119_v38, 1  ;;  %v2138_v34 = vshll.u32 %v660_v53, 8  ;;  %vm687_vm10 = vcmp.lt.s32.totalorder %v2119_v38, 4  ;;  %vm685_vm11 = vcmp.lt.s32.totalorder %v2119_v38, 2 }
 0x10c   : > { %1431 = vst [vmem:[%s2088_s8 + $0x28] sm:$0xff] %v1119_v47  ;;  %v1529_v5 = vadd.s32 4294967294, %v604_v49  ;;  %v683_v16 = vor.u32 %v682_v9, %v681_v7  ;;  %vm686_vm12 = vcmp.lt.s32.totalorder %v2119_v38, 3  ;;  %v692_v36 = vsel %vm684_vm9, %v671_v60, %v2130_v61 }
 0x10d   : > { %v693_v46 = vsel %vm687_vm10, %v680_v30, 920167782  ;;  %v696_v51 = vsel %vm684_vm9, %v2130_v61, %v677_v4  ;;  %v701_v25 = vand.u32 65535, %v2138_v34  ;;  %v702_v56 = vshrl.u32 %v2138_v34, 16 }
 0x10e   : > { %vm1530_vm8 = vcmp.lt.s32.totalorder %v1529_v5, 0  ;;  %v694_v26 = vsel %vm686_vm12, %v677_v4, %v693_v46  ;;  %v697_v3 = vsel %vm687_vm10, %v683_v16, 1326507024  ;;  %vm2166_vm13 = vcmp.le.f32.partialorder %v498_v12, 0.7853982 }
 0x10f   : > { %v607_v32 = vsel %vm1530_vm8, 0, %v1529_v5  ;;  %v695_v8 = vsel %vm685_vm11, %v692_v36, %v694_v26  ;;  %v698_v22 = vsel %vm686_vm12, %v680_v30, %v697_v3  ;;  %v622_v37 = vsub.s32 4, %v2100_v41 }
 0x110   : > { %v608_v0 = vsub.s32 32, %v607_v32  ;;  %v612_v62 = vsub.s32 4294967266, %v607_v32  ;;  %v609_v14 = vshll.u32 %v600_v31, %v607_v32  ;;  %v725_v24 = vand.u32 65535, %v695_v8 }
 0x111   : > { %v699_v23 = vsel %vm685_vm11, %v696_v51, %v698_v22  ;;  %v726_v27 = vshrl.u32 %v695_v8, 16  ;;  %v668_v18 = vshrl.u32 %v1666_v28, %v2104_v59  ;;  %v689_v57 = vsel %vm687_vm10, %v677_v4, 2102212464 }
 0x112   : > { %v610_v52 = vshrl.u32 %v592_v39, %v608_v0  ;;  %v613_v1 = vadd.s32 127, %v612_v62  ;;  %v703_v31 = vand.u32 65535, %v699_v23  ;;  %v704_v35 = vshrl.u32 %v699_v23, 16 }
 0x113   : > { %v728_v2 = vmul.u32 %v726_v27, %v701_v25  ;;  %v729_v15 = vmul.u32 %v725_v24, %v702_v56  ;;  %v688_v12 = vsel %vm684_vm9, %v668_v18, %v671_v60  ;;  %v727_v17 = vmul.u32 %v725_v24, %v701_v25 }
 0x114   : > { %v611_v10 = vor.u32 %v610_v52, %v609_v14  ;;  %v614_v19 = vshll.u32 %v613_v1, 23  ;;  %v706_v29 = vmul.u32 %v704_v35, %v701_v25  ;;  %v707_v40 = vmul.u32 %v703_v31, %v702_v56 }
 0x115   : > { %v730_v42 = vmul.u32 %v726_v27, %v702_v56  ;;  %v731_v20 = vshll.u32 %v728_v2, 16  ;;  %v705_v47 = vmul.u32 %v703_v31, %v701_v25  ;;  %v708_v49 = vmul.u32 %v704_v35, %v702_v56 }
 0x116   : > { %v615_v63 = vor.u32 4788187, %v614_v19  ;;  %v618_v45 = vcvt.s32.f32 %v611_v10  ;;  %v709_v53 = vshll.u32 %v706_v29, 16  ;;  %v711_v54 = vshll.u32 %v707_v40, 16 }
 0x117   : > { %v733_v43 = vshll.u32 %v729_v15, 16  ;;  %vm735_vm15 = vc.u32 %v727_v17, %v731_v20  ;;  %v737_v28 = vadd.s32 %v731_v20, %v727_v17  ;;  %v732_v32 = vshrl.u32 %v728_v2, 16 }
 0x118   : > { %v616_v55 = vand.u32 2147483647, %v615_v63  ;;  %vm713_vm0 = vc.u32 %v705_v47, %v709_v53  ;;  %v715_v21 = vadd.s32 %v709_v53, %v705_v47  ;;  %v736_v5 = vsel %vm735_vm15, 1, %v1672_v50 }
 0x119   : > { %v714_v58 = vsel %vm713_vm0, 1, %v1672_v50  ;;  %v738_v6 = vadd.s32 %v736_v5, %v730_v42  ;;  %vm739_vm1 = vc.u32 %v737_v28, %v733_v43  ;;  %v690_v62 = vsel %vm686_vm12, %v2130_v61, %v689_v57 }
 0x11a   : > { %v619_v48 = vmul.f32 %v618_v45, %v616_v55  ;;  %v716_v7 = vadd.s32 %v714_v58, %v708_v49  ;;  %vm717_vm2 = vc.u32 %v715_v21, %v711_v54  ;;  %v740_v30 = vsel %vm739_vm1, 1, %v1672_v50 }
 0x11b   : > { %v718_v39 = vsel %vm717_vm2, 1, %v1672_v50  ;;  %v742_v0 = vadd.s32 %v740_v30, %v738_v6  ;;  %v710_v16 = vshrl.u32 %v706_v29, 16  ;;  %v623_v46 = vsel %vm500_vm14, %v622_v37, %v2100_v41 }
 0x11c   : > { %v620_v59 = vxor.u32 2147483648, %v619_v48  ;;  %v720_v36 = vadd.s32 %v718_v39, %v716_v7  ;;  %v734_v14 = vshrl.u32 %v729_v15, 16  ;;  %v712_v8 = vshrl.u32 %v707_v40, 16 }
 0x11d   : > { %v743_v52 = vadd.s32 %v742_v0, %v732_v32  ;;  %v691_v50 = vsel %vm685_vm11, %v688_v12, %v690_v62  ;;  %v741_v61 = vadd.s32 %v737_v28, %v733_v43  ;;  %v625_v24 = vsel %vm2166_vm13, 0, %v623_v46 }
 0x11e   : > { %v621_v60 = vsel %vm500_vm14, %v620_v59, %v619_v48  ;;  %v721_v51 = vadd.s32 %v720_v36, %v710_v16  ;;  %v745_v56 = vmul.u32 %v2138_v34, %v691_v50  ;;  %v1264_v35 = vadd.s32 3, %v625_v24 }
 0x11f   : > { %v624_v9 = vsel %vm2166_vm13, %v1786_v44, %v621_v60  ;;  %v744_v3 = vadd.s32 %v743_v52, %v734_v14  ;;  %v642_v15 = vand.u32 3, %v625_v24  ;;  %vm641_vm11 = vweird.f32 %v1786_v44 }
 0x120   : > { %v626_v4 = vmul.f32 %v624_v9, %v624_v9  ;;  %v722_v22 = vadd.s32 %v721_v51, %v712_v8  ;;  %v1265_v29 = vand.u32 3, %v1264_v35  ;;  %vm654_vm14 = vcmp.lt.s32.totalorder %v2066_v33, 0 }
 0x121   : > { %v748_v23 = vadd.s32 1, %v744_v3  ;;  %vm643_vm4 = vcmp.lt.s32.totalorder %v642_v15, 2  ;;  %vm644_vm5 = vcmp.eq.s32.totalorder %v642_v15, 0  ;;  %vm647_vm6 = vcmp.eq.s32.totalorder %v642_v15, 2 }
 0x122   : > { %v627_v1 = vmul.f32 -0.001358992, %v626_v4  ;;  %v634_v26 = vmul.f32 -0.00019511016, %v626_v4  ;;  %vm747_vm3 = vc.u32 %v722_v22, %v741_v61  ;;  %vm1270_vm7 = vcmp.eq.s32.totalorder %v1265_v29, 2 }
 0x123   : > { %v749_v27 = vsel %vm747_vm3, %v748_v23, %v744_v3  ;;  %vm1266_vm8 = vcmp.lt.s32.totalorder %v1265_v29, 2  ;;  %vm1267_vm9 = vcmp.eq.s32.totalorder %v1265_v29, 0  ;;  %v746_v6 = vadd.s32 %v741_v61, %v722_v22 }
 0x124   : > { %v628_v10 = vadd.f32 0.041655596, %v627_v1  ;;  %v635_v19 = vadd.f32 0.008332121, %v634_v26  ;;  %v750_v38 = vadd.s32 %v749_v27, %v745_v56  ;;  %vm653_vm13 = vcmp.le.f32.partialorder %v652_v13, 0.7853982 }
 0x126   : > { %v629_v25 = vmul.f32 %v628_v10, %v626_v4  ;;  %v636_v41 = vmul.f32 %v635_v19, %v626_v4  ;;  %v751_v2 = vadd.s32 536870912, %v750_v38 }
 0x128   : > { %v630_v63 = vadd.f32 -0.4999988, %v629_v25  ;;  %v637_v31 = vadd.f32 -0.16666654, %v636_v41  ;;  %v752_v11 = vshrl.u32 %v751_v2, 30 }
 0x12a   : > { %v631_v37 = vmul.f32 %v630_v63, %v626_v4  ;;  %v638_v18 = vmul.f32 %v637_v31, %v626_v4  ;;  %v753_v17 = vshll.u32 %v752_v11, 30  ;;  %v776_v14 = vsub.s32 4, %v752_v11 }
 0x12c   : > { %v632_v55 = vadd.f32 1.0, %v631_v37  ;;  %v639_v45 = vadd.f32 1.0, %v638_v18  ;;  %v754_v42 = vsub.s32 %v750_v38, %v753_v17  ;;  %v777_v51 = vsel %vm654_vm14, %v776_v14, %v752_v11 }
 0x12d   : > { %v779_v10 = vsel %vm653_vm13, 0, %v777_v51 }
 0x12e   : > { %v640_v40 = vmul.f32 %v639_v45, %v624_v9  ;;  %v648_v12 = vxor.u32 2147483648, %v632_v55  ;;  %vm755_vm10 = vcmp.lt.s32.totalorder %v754_v42, 0  ;;  %v756_v53 = vsub.s32 0, %v754_v42 }
 0x12f   : > { %v1419_v23 = vadd.s32 3, %v779_v10  ;;  %v796_v27 = vand.u32 3, %v779_v10 }
 0x130   : > { %v645_v34 = vxor.u32 2147483648, %v640_v40  ;;  %v649_v20 = vsel %vm647_vm6, %v648_v12, %v640_v40  ;;  %v1272_v48 = vsel %vm1270_vm7, %v648_v12, %v640_v40  ;;  %v757_v21 = vsel %vm755_vm10, %v756_v53, %v754_v42 }
 0x131   : > { %v758_v5 = vclz %v757_v21  ;;  %v1420_v63 = vand.u32 3, %v1419_v23  ;;  %vm797_vm15 = vcmp.lt.s32.totalorder %v796_v27, 2  ;;  %vm798_vm0 = vcmp.eq.s32.totalorder %v796_v27, 0 }
 0x132   : > { %v646_v47 = vsel %vm644_vm5, %v632_v55, %v645_v34  ;;  %v1269_v49 = vsel %vm1267_vm9, %v632_v55, %v645_v34  ;;  %vm801_vm1 = vcmp.eq.s32.totalorder %v796_v27, 2  ;;  %vm795_vm5 = vweird.f32 %v2066_v33 }
 0x133   : > { %v650_v54 = vsel %vm643_vm4, %v646_v47, %v649_v20  ;;  %v1273_v43 = vsel %vm1266_vm8, %v1269_v49, %v1272_v48  ;;  %v1532_v57 = vadd.s32 4294967294, %v758_v5  ;;  %vm1421_vm2 = vcmp.lt.s32.totalorder %v1420_v63, 2 }
 0x134   : > { %v651_v28 = vsel %vm641_vm11, nan, %v650_v54  ;;  %v1274_v59 = vsel %vm641_vm11, nan, %v1273_v43  ;;  %vm1422_vm3 = vcmp.eq.s32.totalorder %v1420_v63, 0  ;;  %vm1425_vm4 = vcmp.eq.s32.totalorder %v1420_v63, 2 }
 0x135   : > { %808 = vst [vmem:[%s2088_s8 + $0x10] sm:$0xff] %v651_v28  ;;  %vm1533_vm12 = vcmp.lt.s32.totalorder %v1532_v57, 0 }
 0x136   : > { %1432 = vst [vmem:[%s2088_s8 + $0x30] sm:$0xff] %v1274_v59  ;;  %v761_v58 = vsel %vm1533_vm12, 0, %v1532_v57 }
 0x137   : > { %v762_v60 = vsub.s32 32, %v761_v58  ;;  %v766_v7 = vsub.s32 4294967266, %v761_v58  ;;  %v763_v30 = vshll.u32 %v754_v42, %v761_v58 }
 0x139   : > { %v764_v9 = vshrl.u32 %v746_v6, %v762_v60  ;;  %v767_v39 = vadd.s32 127, %v766_v7 }
 0x13b   : > { %v765_v32 = vor.u32 %v764_v9, %v763_v30  ;;  %v768_v0 = vshll.u32 %v767_v39, 23 }
 0x13d   : > { %v769_v44 = vor.u32 4788187, %v768_v0  ;;  %v772_v62 = vcvt.s32.f32 %v765_v32 }
 0x13f   : > { %v770_v4 = vand.u32 2147483647, %v769_v44 }
 0x141   : > { %v773_v16 = vmul.f32 %v772_v62, %v770_v4 }
 0x143   : > { %v774_v36 = vxor.u32 2147483648, %v773_v16 }
 0x145   : > { %v775_v46 = vsel %vm654_vm14, %v774_v36, %v773_v16 }
 0x146   : > { %v778_v52 = vsel %vm653_vm13, %v2066_v33, %v775_v46 }
 0x147   : > { %v780_v1 = vmul.f32 %v778_v52, %v778_v52 }
 0x149   : > { %v781_v26 = vmul.f32 -0.001358992, %v780_v1  ;;  %v788_v8 = vmul.f32 -0.00019511016, %v780_v1 }
 0x14b   : > { %v782_v50 = vadd.f32 0.041655596, %v781_v26  ;;  %v789_v3 = vadd.f32 0.008332121, %v788_v8 }
 0x14d   : > { %v783_v19 = vmul.f32 %v782_v50, %v780_v1  ;;  %v790_v22 = vmul.f32 %v789_v3, %v780_v1 }
 0x14f   : > { %v784_v61 = vadd.f32 -0.4999988, %v783_v19  ;;  %v791_v24 = vadd.f32 -0.16666654, %v790_v22 }
 0x151   : > { %v785_v25 = vmul.f32 %v784_v61, %v780_v1  ;;  %v792_v13 = vmul.f32 %v791_v24, %v780_v1 }
 0x153   : > { %v786_v41 = vadd.f32 1.0, %v785_v25  ;;  %v793_v56 = vadd.f32 1.0, %v792_v13 }
 0x155   : > { %v794_v31 = vmul.f32 %v793_v56, %v778_v52  ;;  %v802_v35 = vxor.u32 2147483648, %v786_v41 }
 0x157   : > { %v799_v38 = vxor.u32 2147483648, %v794_v31  ;;  %v803_v18 = vsel %vm801_vm1, %v802_v35, %v794_v31  ;;  %v1427_v15 = vsel %vm1425_vm4, %v802_v35, %v794_v31 }
 0x159   : > { %v800_v37 = vsel %vm798_vm0, %v786_v41, %v799_v38  ;;  %v1424_v2 = vsel %vm1422_vm3, %v786_v41, %v799_v38 }
 0x15a   : > { %v804_v55 = vsel %vm797_vm15, %v800_v37, %v803_v18  ;;  %v1428_v45 = vsel %vm1421_vm2, %v1424_v2, %v1427_v15 }
 0x15b   : > { %v805_v29 = vsel %vm795_vm5, nan, %v804_v55  ;;  %v1429_v11 = vsel %vm795_vm5, nan, %v1428_v45 }
 0x15c   : > { %809 = vst [vmem:[%s2088_s8 + $0x18] sm:$0xff] %v805_v29 }
 0x15d   : > { %1433 = vst [vmem:[%s2088_s8 + $0x38] sm:$0xff] %v1429_v11 }
 0x15e   : > { %1629 = shalt.err (!%p1626_p3)
}
 0x15f   : > { %s1673_s3 = smov 128   ;;  %s1674_s4 = smov 256  }
 0x160   : > { %s1675_s5 = smov 8  }
 0x161   : > { %1553 = dma.vmem_to_hbm [thread:$0]  (%p1729_p5), %s2209_s22, 1024, %s1449_s23, %s1435_s13, %s1673_s3, %s1674_s4, %s1675_s5  }
 0x162 PF: > { %p1559_p4 = scmp.ge.s32.totalorder %s1664_s12, 2  ;;  %s1463_s6 = sand.u32 1, %s1652_s9  }
 0x163   : > { %s1464_s7 = scalar_lea.sflag [#allocation3], %s1463_s6 }
 0x164   : > { %p1556_p7 = pnand %p1559_p4, %p1733_p6 }
 0x166   : > { %p1557_p8 = pneg %p1556_p7 }
 0x168   : > { %1647 = dma.done.wait (%p1557_p8), %s1464_s7, 1024  }
 0x169   : > { %1649 = vsyncadd (%p1557_p8), %s1464_s7, 4294966272  ;;  %p12_p9 = scmp.ge.s32.totalorder %s1716_s15, 4   ;;  %s2255_s9 = smov %s1656_s10 }
 0x16a   : > { %s2256_s10 = smov %s1660_s11  ;;  %s2257_s11 = smov %s1727_s18 }
 0x16b   : > { %s2258_s12 = smov %s1716_s15  ;;  %14 = sbr.rel (!%p12_p9) target bundleno = 3 (0x3), region = 63 }
 0x170   :  { %1470 = vsyncpa [#allocation3], 1 }
 0x171   :  { %1472 = vsyncpa [#allocation3 + $0x1], 1 }

</bundles_post_ra>
